<compile_context>
chip_gen: v6e
topology: v6e:2x2x1
jax: 0.10.0
libtpu: 0.0.40
codegen_flags: <defaults>
</compile_context>

<pallas_src>
import functools

import jax
import jax.numpy as jnp
from jax.experimental import pallas as pl
from jax.experimental.pallas import tpu as pltpu

# ---- module-level constants implied by the PyTorch source -------------------
IMAGE_WIDTH = 16
COLOR_CHANNELS = 3
N_CLASSES = 10

IN_FEATURES = IMAGE_WIDTH * IMAGE_WIDTH * COLOR_CHANNELS  # 768

_LANE = 128
_OUT_PAD = _LANE        # lane-dense logits block: 10 real classes + 118 padded
_NEG_BIG = -1e30        # bias for padded class lanes -> excluded from softmax


def _round_up(x, m):
    return (x + m - 1) // m * m


def _activation(h, activation):
    if activation == "relu":
        return jnp.maximum(h, 0.0)
    elif activation == "sigmoid":
        return jax.nn.sigmoid(h)
    else:
        raise ValueError(f"unsupported activation: {activation}")


def _log_softmax_store(logits, o_ref):
    # Padded class lanes carry a -1e30 bias, so exp() underflows to 0 and they
    # do not perturb the max / sum over the 10 real classes.  Math stays f32;
    # only the final store is cast to the (bf16) output dtype.
    m = jnp.max(logits, axis=-1, keepdims=True)
    s = logits - m
    lse = jnp.log(jnp.sum(jnp.exp(s), axis=-1, keepdims=True))
    o_ref[...] = (s - lse).astype(o_ref.dtype)


# ------------------------------- kernels --------------------------------------
def _mlp_kernel_2layer(x_ref, w1_ref, b1_ref, w2_ref, b2_ref, wo_ref, bo_ref,
                       o_ref, *, activation, compute_dtype):
    # In-kernel bf16 cast of the f32 input block (VPU work hidden under DMA);
    # f32 accumulation on the MXU.  Dropout == identity at inference.
    x = x_ref[...].astype(compute_dtype)
    h = jnp.dot(x, w1_ref[...],
                preferred_element_type=jnp.float32) + b1_ref[...]
    h = _activation(h, activation)
    # fc2 + act
    h = jnp.dot(h.astype(compute_dtype), w2_ref[...],
                preferred_element_type=jnp.float32) + b2_ref[...]
    h = _activation(h, activation)
    # output projection (lane-dense, padded to 128 classes)
    logits = jnp.dot(h.astype(compute_dtype), wo_ref[...],
                     preferred_element_type=jnp.float32) + bo_ref[...]
    _log_softmax_store(logits, o_ref)


def _mlp_kernel_1layer(x_ref, w1_ref, b1_ref, wo_ref, bo_ref, o_ref, *,
                       activation, compute_dtype):
    x = x_ref[...].astype(compute_dtype)
    h = jnp.dot(x, w1_ref[...],
                preferred_element_type=jnp.float32) + b1_ref[...]
    h = _activation(h, activation)
    logits = jnp.dot(h.astype(compute_dtype), wo_ref[...],
                     preferred_element_type=jnp.float32) + bo_ref[...]
    _log_softmax_store(logits, o_ref)


# ------------------------------ parameters ------------------------------------
def init_mlp_params(key, n_hidden_nodes, n_hidden_layers):
    """Deterministic parameter init (PyTorch-Linear-style uniform fan-in)."""
    def linear(k, fan_in, fan_out):
        kw, kb = jax.random.split(k)
        bound = 1.0 / jnp.sqrt(jnp.float32(fan_in))
        # stored as (in, out) so the kernel computes x @ W
        w = jax.random.uniform(kw, (fan_in, fan_out), jnp.float32,
                               -bound, bound)
        b = jax.random.uniform(kb, (1, fan_out), jnp.float32, -bound, bound)
        return w, b

    keys = jax.random.split(key, 3)
    params = {}
    params["w1"], params["b1"] = linear(keys[0], IN_FEATURES, n_hidden_nodes)
    if n_hidden_layers == 2:
        params["w2"], params["b2"] = linear(keys[1], n_hidden_nodes,
                                            n_hidden_nodes)
    params["wo"], params["bo"] = linear(keys[2], n_hidden_nodes, N_CLASSES)
    return params


def _prepare_padded_params(params, n_hidden_layers, compute_dtype):
    """Zero-pad the hidden dim to a 128-lane multiple, pad classes to 128
    lanes, and cast weight matrices to the (bf16) matmul dtype.  Biases stay
    f32 so they add directly onto the f32 MXU accumulator."""
    h = params["w1"].shape[1]
    h_pad = _round_up(h, _LANE)

    def padw(w, rows, cols):
        return jnp.pad(
            w, ((0, rows - w.shape[0]), (0, cols - w.shape[1]))
        ).astype(compute_dtype)

    def padb(bias, cols, fill=0.0):
        return jnp.pad(bias, ((0, 0), (0, cols - bias.shape[1])),
                       constant_values=fill).astype(jnp.float32)

    out = {
        "w1": padw(params["w1"], IN_FEATURES, h_pad),
        "b1": padb(params["b1"], h_pad),
        "wo": padw(params["wo"], h_pad, _OUT_PAD),
        "bo": padb(params["bo"], _OUT_PAD, fill=_NEG_BIG),
    }
    if n_hidden_layers == 2:
        out["w2"] = padw(params["w2"], h_pad, h_pad)
        out["b2"] = padb(params["b2"], h_pad)
    return out, h_pad


# -------------------------------- wrapper --------------------------------------
def mlp_forward(x_nchw, params, *, n_hidden_layers, activation,
                block_batch=None, compute_dtype=jnp.bfloat16):
    """x_nchw: (B, COLOR_CHANNELS, IMAGE_WIDTH, IMAGE_WIDTH) float32."""
    b = x_nchw.shape[0]
    # Contiguous NCHW -> (B, 768) reshape is a free bitcast; keep f32 so the
    # kernel reads x from HBM exactly once (cast to bf16 happens in-kernel).
    x = x_nchw.reshape(b, IN_FEATURES)

    # Batch tile:
    #   * multiple of 16 -> satisfies bf16 (16,128) output tiling;
    #   * cdiv(b,2) term -> >=2 grid steps for mid-sized batches so the
    #     "parallel" batch axis shards across both v7x TensorCores;
    #   * cap 1024 -> f32 x block 3 MiB (x2 buffers) + bf16 out 0.25 MiB (x2)
    #     + ~1 MiB weights fits every generation's scoped VMEM (incl. v7x).
    #     On v6e/v5e (128 MiB VMEM) tb=2048-4096 with vmem_limit ~64 MiB shaves
    #     a few extra % of per-step overhead if desired.
    if block_batch is None:
        block_batch = min(1024, _round_up(pl.cdiv(b, 2), 16))
    tb = block_batch
    # No wrapper-side batch pad: Pallas clips the ragged last block (bounded
    # read DMA; masked writeback), so garbage only ever lives in VMEM rows >= b.
    grid = (pl.cdiv(b, tb),)

    pparams, h_pad = _prepare_padded_params(params, n_hidden_layers,
                                            compute_dtype)

    if n_hidden_layers == 2:
        kernel = functools.partial(_mlp_kernel_2layer, activation=activation,
                                   compute_dtype=compute_dtype)
        args = (x, pparams["w1"], pparams["b1"], pparams["w2"], pparams["b2"],
                pparams["wo"], pparams["bo"])
    else:
        kernel = functools.partial(_mlp_kernel_1layer, activation=activation,
                                   compute_dtype=compute_dtype)
        args = (x, pparams["w1"], pparams["b1"], pparams["wo"], pparams["bo"])

    x_spec = pl.BlockSpec((tb, IN_FEATURES), lambda i: (i, 0))
    out_spec = pl.BlockSpec((tb, _OUT_PAD), lambda i: (i, 0))

    def resident(shape):
        # Whole array, same block every grid step -> stays VMEM-resident.
        return pl.BlockSpec(shape, lambda i: (0, 0))

    in_specs = [x_spec] + [resident(a.shape) for a in args[1:]]

    weight_bytes = sum(int(a.size) * a.dtype.itemsize for a in args[1:])
    matmul_flops = IN_FEATURES * h_pad + h_pad * _OUT_PAD
    if n_hidden_layers == 2:
        matmul_flops += h_pad * h_pad
    transcendentals = b * _OUT_PAD              # exp in log_softmax
    if activation == "sigmoid":
        transcendentals += b * h_pad * n_hidden_layers
    cost = pl.CostEstimate(
        flops=2 * b * matmul_flops,
        transcendentals=transcendentals,
        bytes_accessed=(b * IN_FEATURES * 4      # f32 x read
                        + b * _OUT_PAD * 2       # bf16 log-prob writeback
                        + weight_bytes),
    )

    out = pl.pallas_call(
        kernel,
        out_shape=jax.ShapeDtypeStruct((b, _OUT_PAD), jnp.bfloat16),
        grid=grid,
        in_specs=in_specs,
        out_specs=out_spec,
        compiler_params=pltpu.CompilerParams(
            dimension_semantics=("parallel",),  # batch axis -> both TCs on v7x
            vmem_limit_bytes=32 * 1024 * 1024,
        ),
        cost_estimate=cost,
    )(*args)

    # Slice off the 118 padded class lanes; tiny f32 cast for API parity with
    # the torch module (log-prob math in the kernel was f32, store was bf16).
    return out[:b, :N_CLASSES].astype(jnp.float32)


def mlp_reference(x_nchw, params, *, n_hidden_layers, activation,
                  compute_dtype=jnp.bfloat16):
    """Pure-JAX reference (same bf16-input / f32-accum matmul precision)."""
    b = x_nchw.shape[0]
    x = x_nchw.reshape(b, IN_FEATURES)
    act = jax.nn.relu if activation == "relu" else jax.nn.sigmoid

    def lin(h, w, bias):
        return jnp.dot(h.astype(compute_dtype), w.astype(compute_dtype),
                       preferred_element_type=jnp.float32) + bias

    h = act(lin(x, params["w1"], params["b1"]))
    if n_hidden_layers == 2:
        h = act(lin(h, params["w2"], params["b2"]))
    logits = lin(h, params["wo"], params["bo"])
    return jax.nn.log_softmax(logits, axis=-1)


if __name__ == "__main__":
    key = jax.random.PRNGKey(0)
    k_x, k_p1, k_p2 = jax.random.split(key, 3)

    # input in PyTorch NCHW layout
    x = jax.random.normal(
        k_x, (2, COLOR_CHANNELS, IMAGE_WIDTH, IMAGE_WIDTH), jnp.float32)

    configs = [
        (k_p1, dict(n_hidden_nodes=32, n_hidden_layers=2, activation="relu")),
        (k_p2, dict(n_hidden_nodes=32, n_hidden_layers=1, activation="sigmoid")),
    ]
    for k_p, cfg in configs:
        params = init_mlp_params(k_p, cfg["n_hidden_nodes"],
                                 cfg["n_hidden_layers"])
        out = mlp_forward(x, params, n_hidden_layers=cfg["n_hidden_layers"],
                          activation=cfg["activation"])
        out = jax.block_until_ready(out)

        ref = mlp_reference(x, params, n_hidden_layers=cfg["n_hidden_layers"],
                            activation=cfg["activation"])
        assert out.shape == (2, N_CLASSES)
        err = float(jnp.max(jnp.abs(out - ref)))
        assert jnp.allclose(out, ref, atol=3e-2, rtol=2e-2), err

    print("KERNEL_OK")
</pallas_src>

<mosaic_0001>
module attributes {stable_mosaic.version = 11 : i64} {
  func.func @_mlp_kernel_2layer(%arg0: i32, %arg1: memref<16x768xf32, #tpu.memory_space<vmem>>, %arg2: memref<768x128xbf16, #tpu.memory_space<vmem>>, %arg3: memref<1x128xf32, #tpu.memory_space<vmem>>, %arg4: memref<128x128xbf16, #tpu.memory_space<vmem>>, %arg5: memref<1x128xf32, #tpu.memory_space<vmem>>, %arg6: memref<128x128xbf16, #tpu.memory_space<vmem>>, %arg7: memref<1x128xf32, #tpu.memory_space<vmem>>, %arg8: memref<16x128xbf16, #tpu.memory_space<vmem>>) attributes {dimension_semantics = [#tpu.dimension_semantics<parallel>], iteration_bounds = array<i64: 1>, scalar_prefetch = 0 : i64, scratch_operands = 0 : i64, tpu.core_type = #tpu.core_type<tc>, window_params = [{transform_indices = @transform_0, window_bounds = array<i64: 16, 768>}, {pipeline_mode = #tpu.pipeline_mode<synchronous>, transform_indices = @transform_1, window_bounds = array<i64: 768, 128>}, {pipeline_mode = #tpu.pipeline_mode<synchronous>, transform_indices = @transform_2, window_bounds = array<i64: 1, 128>}, {pipeline_mode = #tpu.pipeline_mode<synchronous>, transform_indices = @transform_3, window_bounds = array<i64: 128, 128>}, {pipeline_mode = #tpu.pipeline_mode<synchronous>, transform_indices = @transform_4, window_bounds = array<i64: 1, 128>}, {pipeline_mode = #tpu.pipeline_mode<synchronous>, transform_indices = @transform_5, window_bounds = array<i64: 128, 128>}, {pipeline_mode = #tpu.pipeline_mode<synchronous>, transform_indices = @transform_6, window_bounds = array<i64: 1, 128>}, {transform_indices = @transform_7, window_bounds = array<i64: 16, 128>}]} {
    %c0 = arith.constant 0 : index
    %c0_0 = arith.constant 0 : index
    %0 = vector.load %arg1[%c0, %c0_0] : memref<16x768xf32, #tpu.memory_space<vmem>>, vector<16x768xf32>
    %1 = arith.truncf %0 : vector<16x768xf32> to vector<16x768xbf16>
    %c0_1 = arith.constant 0 : index
    %c0_2 = arith.constant 0 : index
    %2 = vector.load %arg2[%c0_1, %c0_2] : memref<768x128xbf16, #tpu.memory_space<vmem>>, vector<768x128xbf16>
    %cst = arith.constant dense<0.000000e+00> : vector<16x128xf32>
    %3 = tpu.matmul %1, %2, %cst {dimension_numbers = #tpu.dot_dimension_numbers<[1], [0], [0], [1], [0, 0, 1, 1], [], []>} : vector<16x768xbf16>, vector<768x128xbf16>, vector<16x128xf32> -> vector<16x128xf32>
    %c0_3 = arith.constant 0 : index
    %c0_4 = arith.constant 0 : index
    %4 = vector.load %arg3[%c0_3, %c0_4] : memref<1x128xf32, #tpu.memory_space<vmem>>, vector<1x128xf32>
    %5 = vector.broadcast %4 : vector<1x128xf32> to vector<16x128xf32>
    %6 = arith.addf %3, %5 : vector<16x128xf32>
    %cst_5 = arith.constant 0.000000e+00 : f32
    %7 = vector.broadcast %cst_5 : f32 to vector<16x128xf32>
    %8 = arith.maximumf %6, %7 : vector<16x128xf32>
    %9 = arith.truncf %8 : vector<16x128xf32> to vector<16x128xbf16>
    %c0_6 = arith.constant 0 : index
    %c0_7 = arith.constant 0 : index
    %10 = vector.load %arg4[%c0_6, %c0_7] : memref<128x128xbf16, #tpu.memory_space<vmem>>, vector<128x128xbf16>
    %cst_8 = arith.constant dense<0.000000e+00> : vector<16x128xf32>
    %11 = tpu.matmul %9, %10, %cst_8 {dimension_numbers = #tpu.dot_dimension_numbers<[1], [0], [0], [1], [0, 0, 1, 1], [], []>} : vector<16x128xbf16>, vector<128x128xbf16>, vector<16x128xf32> -> vector<16x128xf32>
    %c0_9 = arith.constant 0 : index
    %c0_10 = arith.constant 0 : index
    %12 = vector.load %arg5[%c0_9, %c0_10] : memref<1x128xf32, #tpu.memory_space<vmem>>, vector<1x128xf32>
    %13 = vector.broadcast %12 : vector<1x128xf32> to vector<16x128xf32>
    %14 = arith.addf %11, %13 : vector<16x128xf32>
    %cst_11 = arith.constant 0.000000e+00 : f32
    %15 = vector.broadcast %cst_11 : f32 to vector<16x128xf32>
    %16 = arith.maximumf %14, %15 : vector<16x128xf32>
    %17 = arith.truncf %16 : vector<16x128xf32> to vector<16x128xbf16>
    %c0_12 = arith.constant 0 : index
    %c0_13 = arith.constant 0 : index
    %18 = vector.load %arg6[%c0_12, %c0_13] : memref<128x128xbf16, #tpu.memory_space<vmem>>, vector<128x128xbf16>
    %cst_14 = arith.constant dense<0.000000e+00> : vector<16x128xf32>
    %19 = tpu.matmul %17, %18, %cst_14 {dimension_numbers = #tpu.dot_dimension_numbers<[1], [0], [0], [1], [0, 0, 1, 1], [], []>} : vector<16x128xbf16>, vector<128x128xbf16>, vector<16x128xf32> -> vector<16x128xf32>
    %c0_15 = arith.constant 0 : index
    %c0_16 = arith.constant 0 : index
    %20 = vector.load %arg7[%c0_15, %c0_16] : memref<1x128xf32, #tpu.memory_space<vmem>>, vector<1x128xf32>
    %21 = vector.broadcast %20 : vector<1x128xf32> to vector<16x128xf32>
    %22 = arith.addf %19, %21 : vector<16x128xf32>
    %cst_17 = arith.constant dense<0xFF800000> : vector<16xf32>
    %23 = vector.multi_reduction <maximumf>, %22, %cst_17 [1] : vector<16x128xf32> to vector<16xf32>
    %24 = vector.shape_cast %23 : vector<16xf32> to vector<16x1xf32>
    %25 = vector.broadcast %24 : vector<16x1xf32> to vector<16x128xf32>
    %26 = arith.subf %22, %25 : vector<16x128xf32>
    %27 = math.exp %26 : vector<16x128xf32>
    %cst_18 = arith.constant dense<0.000000e+00> : vector<16xf32>
    %28 = vector.multi_reduction <add>, %27, %cst_18 [1] : vector<16x128xf32> to vector<16xf32>
    %29 = vector.shape_cast %28 : vector<16xf32> to vector<16x1xf32>
    %30 = math.log %29 : vector<16x1xf32>
    %31 = vector.broadcast %30 : vector<16x1xf32> to vector<16x128xf32>
    %32 = arith.subf %26, %31 : vector<16x128xf32>
    %33 = arith.truncf %32 : vector<16x128xf32> to vector<16x128xbf16>
    %c0_19 = arith.constant 0 : index
    %c0_20 = arith.constant 0 : index
    %34 = vector.load %arg8[%c0_19, %c0_20] : memref<16x128xbf16, #tpu.memory_space<vmem>>, vector<16x128xbf16>
    tpu.vector_store %arg8[%c0_19, %c0_20], %33 {strides = array<i32>} : memref<16x128xbf16, #tpu.memory_space<vmem>>, vector<16x128xbf16>,
    return
  }
  func.func @transform_0(%arg0: i32) -> (i32, i32) {
    %c0_i32 = arith.constant 0 : i32
    %c0_i32_0 = arith.constant 0 : i32
    return %arg0, %c0_i32 : i32, i32
  }
  func.func @transform_1(%arg0: i32) -> (i32, i32) {
    %c0_i32 = arith.constant 0 : i32
    %c0_i32_0 = arith.constant 0 : i32
    %c0_i32_1 = arith.constant 0 : i32
    return %c0_i32, %c0_i32_0 : i32, i32
  }
  func.func @transform_2(%arg0: i32) -> (i32, i32) {
    %c0_i32 = arith.constant 0 : i32
    %c0_i32_0 = arith.constant 0 : i32
    %c0_i32_1 = arith.constant 0 : i32
    return %c0_i32, %c0_i32_0 : i32, i32
  }
  func.func @transform_3(%arg0: i32) -> (i32, i32) {
    %c0_i32 = arith.constant 0 : i32
    %c0_i32_0 = arith.constant 0 : i32
    %c0_i32_1 = arith.constant 0 : i32
    return %c0_i32, %c0_i32_0 : i32, i32
  }
  func.func @transform_4(%arg0: i32) -> (i32, i32) {
    %c0_i32 = arith.constant 0 : i32
    %c0_i32_0 = arith.constant 0 : i32
    %c0_i32_1 = arith.constant 0 : i32
    return %c0_i32, %c0_i32_0 : i32, i32
  }
  func.func @transform_5(%arg0: i32) -> (i32, i32) {
    %c0_i32 = arith.constant 0 : i32
    %c0_i32_0 = arith.constant 0 : i32
    %c0_i32_1 = arith.constant 0 : i32
    return %c0_i32, %c0_i32_0 : i32, i32
  }
  func.func @transform_6(%arg0: i32) -> (i32, i32) {
    %c0_i32 = arith.constant 0 : i32
    %c0_i32_0 = arith.constant 0 : i32
    %c0_i32_1 = arith.constant 0 : i32
    return %c0_i32, %c0_i32_0 : i32, i32
  }
  func.func @transform_7(%arg0: i32) -> (i32, i32) {
    %c0_i32 = arith.constant 0 : i32
    %c0_i32_0 = arith.constant 0 : i32
    return %arg0, %c0_i32 : i32, i32
  }
}

</mosaic_0001>

<bundles_post_ra>
// kernel: tpu_custom_call.1
= control target key start
LH: loop header
LB: loop body
LE: loop exit
PB: predicated region body
PF: predicated region fallthrough
CT: control target
= control target key end

     0   :  { %12 = vsyncpa [#allocation3], 0  ;;  %s1622_s0 = inlined_call_operand.hbm [shape: f32[2,768], index: 0, kind: input, shape index: {}]   ;;  %s1623_s1 = inlined_call_operand.hbm [shape: bf16[768,128], index: 1, kind: input, shape index: {}]   ;;  %s1624_s2 = inlined_call_operand.vmem [shape: f32[1,128], index: 2, kind: input, shape index: {}]   ;;  %s1625_s3 = inlined_call_operand.hbm [shape: bf16[128,128], index: 3, kind: input, shape index: {}]   ;;  %s1626_s4 = inlined_call_operand.vmem [shape: f32[1,128], index: 4, kind: input, shape index: {}]   ;;  %s1627_s5 = inlined_call_operand.hbm [shape: bf16[128,128], index: 5, kind: input, shape index: {}]   ;;  %s1628_s6 = inlined_call_operand.vmem [shape: f32[1,128], index: 6, kind: input, shape index: {}]   ;;  %s1629_s7 = inlined_call_operand.hbm [shape: bf16[2,128], index: 7, kind: output, shape index: {}]  }
   0x1   :  { %13 = vsyncpa [#allocation6], 0 }
   0x2   :  { %14 = vsyncpa [#allocation9], 0 }
   0x3   :  { %15 = vsyncpa [#allocation4], 0 }
   0x4   :  { %20 = vsyncadd [#allocation3], 1344  ;;  %s1498_s24 = smov [#allocation5]  }
   0x5   :  { %s33_s25 = sshll.u32 %s1498_s24, 4  ;;  %s34_s25 = int_to_ptr.vmem [resolvable:$true] %s33_s25 }
   0x6   :  { %s1398_s26 = scalar_lea.vmem %s34_s25, 6144  ;;  %p1403_p1 = scmp.lt.s32.totalorder %s34_s25, %s34_s25 }
   0x7   :  { %p1399_p0 = scmp.ne.s32.totalorder %s34_s25, %s1398_s26  ;;  %p1404_p2 = scmp.lt.s32.totalorder %s1398_s26, %s1398_s26 }
   0x9   :  { %p1405_p3 = por %p1404_p2, %p1403_p1 }
   0xb   :  { %p1406_p4 = pnand %p1405_p3, %p1399_p0 }
   0xd   :  { %1409 = shalt.err (!%p1406_p4)
}
   0xe   :  { %s1499_s27 = smov 64   ;;  %s1500_s28 = smov 4  }
   0xf   :  { %39 = dma.hbm_to_vmem [thread:$0]  %s1623_s1, 6144, %s34_s25, [#allocation6], %s1499_s27, %s1499_s27, %s1500_s28  }
  0x10   :  { %s1501_s8 = smov [#allocation2]  }
  0x11   :  { %s21_s9 = sshll.u32 %s1501_s8, 4  ;;  %s22_s9 = int_to_ptr.vmem [resolvable:$true] %s21_s9 }
  0x12   :  { %s1418_s10 = scalar_lea.vmem %s22_s9, 192  ;;  %s1422_s11 = scalar_lea.vmem %s22_s9, 1536 }
  0x13   :  { %p1419_p5 = scmp.ne.s32.totalorder %s22_s9, %s1418_s10  ;;  %p1423_p6 = scmp.lt.s32.totalorder %s22_s9, %s22_s9 }
  0x14   :  { %p1424_p7 = scmp.lt.s32.totalorder %s1422_s11, %s1418_s10 }
  0x16   :  { %p1425_p8 = por %p1424_p7, %p1423_p6 }
  0x18   :  { %p1426_p9 = pnand %p1425_p8, %p1419_p5 }
  0x1a   :  { %1429 = shalt.err (!%p1426_p9)
}
  0x1b   :  { %s1502_s12 = smov 192   ;;  %s1503_s13 = smov 12  }
  0x1c   :  { %27 = dma.hbm_to_vmem [thread:$0]  %s1622_s0, 192, %s22_s9, [#allocation3], %s1502_s12, %s1502_s12, %s1503_s13  }
  0x1d   :  { %s1504_s16 = smov [#allocation7]   ;;  %s1505_s1 = smov [#allocation8]  }
  0x1e   :  { %s47_s17 = sshll.u32 %s1504_s16, 4  ;;  %s61_s18 = sshll.u32 %s1505_s1, 4  ;;  %s48_s17 = int_to_ptr.vmem [resolvable:$true] %s47_s17  ;;  %s62_s18 = int_to_ptr.vmem [resolvable:$true] %s61_s18 }
  0x1f   :  { %s1438_s19 = scalar_lea.vmem %s48_s17, 1024  ;;  %p1443_p11 = scmp.lt.s32.totalorder %s48_s17, %s48_s17 }
  0x20   :  { %p1439_p10 = scmp.ne.s32.totalorder %s48_s17, %s1438_s19  ;;  %p1444_p12 = scmp.lt.s32.totalorder %s1438_s19, %s1438_s19 }
  0x22   :  { %p1445_p13 = por %p1444_p12, %p1443_p11 }
  0x24   :  { %p1446_p0 = pnand %p1445_p13, %p1439_p10 }
  0x26   :  { %1449 = shalt.err (!%p1446_p0)
}
  0x27   :  { %53 = dma.hbm_to_vmem [thread:$0]  %s1625_s3, 1024, %s48_s17, [#allocation6], %s1499_s27, %s1499_s27, %s1500_s28  }
  0x28   :  { %s1458_s0 = scalar_lea.vmem %s62_s18, 1024  ;;  %p1463_p2 = scmp.lt.s32.totalorder %s62_s18, %s62_s18 }
  0x29   :  { %p1459_p1 = scmp.ne.s32.totalorder %s62_s18, %s1458_s0  ;;  %p1464_p3 = scmp.lt.s32.totalorder %s1458_s0, %s1458_s0 }
  0x2b   :  { %p1465_p4 = por %p1464_p3, %p1463_p2 }
  0x2d   :  { %p1466_p5 = pnand %p1465_p4, %p1459_p1 }
  0x2f   :  { %1469 = shalt.err (!%p1466_p5)
}
  0x30   :  { %67 = dma.hbm_to_vmem [thread:$0]  %s1627_s5, 1024, %s62_s18, [#allocation9], %s1499_s27, %s1499_s27, %s1500_s28  }
  0x31   :  { %1490 = dma.done.wait [#allocation3], 1536  }
  0x32   :  { %1491 = vsyncadd [#allocation3], 4294965760 }
  0x33   :  { %1492 = dma.done.wait [#allocation6], 7168  }
  0x34   :  { %1493 = vsyncadd [#allocation6], 4294960128 }
  0x35   :  { %1494 = dma.done.wait [#allocation9], 1024  }
  0x36   :  { %1495 = vsyncadd [#allocation9], 4294966272  ;;  %v1302_v0 = vld [vmem:[#allocation5 + $0x78] sm:$0xff]   ;;  %v1306_v4 = vld [vmem:[#allocation5 + $0x70] sm:$0xff]   ;;  %v1506_v24 = vmov 1983009808   ;;  %v122_v26 = vlaneseq }
  0x37   :  { %v1303_v1 = vld [vmem:[#allocation5 + $0x38] sm:$0xff]   ;;  %1163 = vmatprep.subr.bf16.mxu0 %v1302_v0  ;;  %v1307_v5 = vld [vmem:[#allocation5 + $0x30] sm:$0xff]   ;;  %v1310_v8 = vld [vmem:[#allocation5 + $0x68] sm:$0xff]   ;;  %v120_v25 = vunpack.c.l.s4 %v1506_v24  ;;  %vm1508_vm0 = vmmov 0  }
  0x38   :  { %v1304_v2 = vld [vmem:[#allocation5 + $0xf8] sm:$0xff]   ;;  %1164 = vmatpush3.bf16.msra.mxu0 %v1303_v1  ;;  %v1308_v6 = vld [vmem:[#allocation5 + $0xf0] sm:$0xff]   ;;  %v1311_v9 = vld [vmem:[#allocation5 + $0x28] sm:$0xff]   ;;  %v1574_v32 = vshrl.u32 %v122_v26, 7 }
  0x39   :  { %v1305_v3 = vld [vmem:[#allocation5 + $0xb8] sm:$0xff]   ;;  %1185 = vmatprep.subr.bf16.mxu1 %v1304_v2  ;;  %1165 = vmatprep.subr.bf16.mxu0 %v1306_v4  ;;  %v1309_v7 = vld [vmem:[#allocation5 + $0xb0] sm:$0xff]   ;;  %v1312_v10 = vld [vmem:[#allocation5 + $0xe8] sm:$0xff]   ;;  %v121_v31 = vunpack.c.0.s8 %v120_v25 }
  0x3a   :  { %1186 = vmatpush3.bf16.msra.mxu1 %v1305_v3  ;;  %v1313_v11 = vld [vmem:[#allocation5 + $0xa8] sm:$0xff]   ;;  %v1314_v12 = vld [vmem:[#allocation5 + $0x60] sm:$0xff]   ;;  %v1318_v16 = vld [vmem:[#allocation5 + $0x58] sm:$0xff]  }
  0x3b   :  { %1187 = vmatprep.subr.bf16.mxu1 %v1308_v6  ;;  %v1315_v13 = vld [vmem:[#allocation5 + $0x20] sm:$0xff]   ;;  %v1319_v17 = vld [vmem:[#allocation5 + $0x18] sm:$0xff]   ;;  %v1322_v20 = vld [vmem:[#allocation5 + $0x50] sm:$0xff]   ;;  %v1577_v36 = vsub.s32 %v121_v31, %v1574_v32 }
  0x3c   :  { %1166 = vmatpush3.bf16.msra.mxu0 %v1307_v5  ;;  %v1316_v14 = vld [vmem:[#allocation5 + $0xe0] sm:$0xff]   ;;  %v1320_v18 = vld [vmem:[#allocation5 + $0xd8] sm:$0xff]   ;;  %v1323_v21 = vld [vmem:[#allocation5 + $0x10] sm:$0xff]  }
  0x3d   :  { %1167 = vmatprep.subr.bf16.mxu0 %v1310_v8  ;;  %v1317_v15 = vld [vmem:[#allocation5 + $0xa0] sm:$0xff]   ;;  %v1321_v19 = vld [vmem:[#allocation5 + $0x98] sm:$0xff]   ;;  %v1324_v22 = vld [vmem:[#allocation5 + $0xd0] sm:$0xff]  }
  0x3e   :  { %1188 = vmatpush3.bf16.msra.mxu1 %v1309_v7  ;;  %v1325_v23 = vld [vmem:[#allocation5 + $0x90] sm:$0xff]   ;;  %v1326_v27 = vld [vmem:[#allocation5 + $0x48] sm:$0xff]   ;;  %v1330_v33 = vld [vmem:[#allocation5 + $0x40] sm:$0xff]  }
  0x3f   :  { %1189 = vmatprep.subr.bf16.mxu1 %v1312_v10  ;;  %v1327_v28 = vld [vmem:[#allocation5 + $0x8] sm:$0xff]   ;;  %v1331_v34 = vld [vmem:[#allocation5] sm:$0xff]   ;;  %v1337_v39 = vld [vmem:[#allocation2 + $0x30] ss:$12 sps:$4 sm:$0xff]  }
  0x40   :  { %1168 = vmatpush3.bf16.msra.mxu0 %v1311_v9  ;;  %v1328_v29 = vld [vmem:[#allocation5 + $0xc8] sm:$0xff]   ;;  %v1332_v35 = vld [vmem:[#allocation5 + $0xc0] sm:$0xff]   ;;  %v179_v44 = vrot.slane %v1337_v39, %v1577_v36  ;;  %v1342_v46 = vld [vmem:[#allocation5 + $0x178] sm:$0xff]  }
  0x41   :  { %1169 = vmatprep.subr.bf16.mxu0 %v1314_v12  ;;  %v1329_v30 = vld [vmem:[#allocation5 + $0x88] sm:$0xff]   ;;  %v1335_v38 = vld [vmem:[#allocation2 + $0x18] ss:$12 sps:$4 sm:$0xff]   ;;  %v1345_v49 = vld [vmem:[#allocation2 + $0x34] ss:$12 sps:$4 sm:$0xff]  }
  0x42   :  { %1190 = vmatpush3.bf16.msra.mxu1 %v1313_v11  ;;  %v1333_v37 = vld [vmem:[#allocation2] ss:$12 sps:$4 sm:$0xff]   ;;  %v1339_v40 = vld [vmem:[#allocation2 + $0x48] ss:$12 sps:$4 sm:$0xff]   ;;  %v139_v43 = vrot.slane %v1335_v38, %v1577_v36  ;;  %v1343_v47 = vld [vmem:[#allocation2 + $0x4] ss:$12 sps:$4 sm:$0xff]   ;;  %v186_v57 = vrot.slane %v1345_v49, %v1577_v36 }
  0x43   :  { %1191 = vmatprep.subr.bf16.mxu1 %v1316_v14  ;;  %v125_v41 = vrot.slane %v1333_v37, %v1577_v36  ;;  %v1341_v42 = vld [vmem:[#allocation5 + $0x80] sm:$0xff]   ;;  %v193_v45 = vrot.slane %v1339_v40, %v1577_v36  ;;  %v1344_v48 = vld [vmem:[#allocation2 + $0x1c] ss:$12 sps:$4 sm:$0xff]   ;;  %v1346_v54 = vld [vmem:[#allocation2 + $0x4c] ss:$12 sps:$4 sm:$0xff]   ;;  %v132_v55 = vrot.slane %v1343_v47, %v1577_v36 }
  0x44   :  { %1170 = vmatpush3.bf16.msra.mxu0 %v1315_v13  ;;  %v146_v56 = vrot.slane %v1344_v48, %v1577_v36  ;;  %v200_v60 = vrot.slane %v1346_v54, %v1577_v36  ;;  %v1347_v61 = vld [vmem:[#allocation5 + $0x138] sm:$0xff]   ;;  %v1348_v0 = vld [vmem:[#allocation5 + $0x170] sm:$0xff]   ;;  %v1350_v6 = vld [vmem:[#allocation5 + $0x168] sm:$0xff]  }
  0x45   :  { %1171 = vmatprep.subr.bf16.mxu0 %v1318_v16  ;;  %v148_v50 = vcombine.high %v125_v41, %v139_v43  ;;  %v202_v51 = vcombine.high %v179_v44, %v193_v45  ;;  %v147_v52 = vcombine.low %v125_v41, %v139_v43  ;;  %v201_v53 = vcombine.low %v179_v44, %v193_v45  ;;  %v1349_v5 = vld [vmem:[#allocation5 + $0x130] sm:$0xff]   ;;  %v1351_v7 = vld [vmem:[#allocation5 + $0x128] sm:$0xff]   ;;  %v1352_v8 = vld [vmem:[#allocation5 + $0x160] sm:$0xff]  }
  0x46   :  { %1192 = vmatpush3.bf16.msra.mxu1 %v1317_v15  ;;  %v150_v62 = vcombine.high %v132_v55, %v146_v56  ;;  %v149_v63 = vcombine.low %v132_v55, %v146_v56  ;;  %v204_v1 = vcombine.high %v186_v57, %v200_v60  ;;  %v203_v2 = vcombine.low %v186_v57, %v200_v60  ;;  %v1353_v9 = vld [vmem:[#allocation5 + $0x120] sm:$0xff]   ;;  %v1354_v10 = vld [vmem:[#allocation5 + $0x158] sm:$0xff]   ;;  %v1356_v12 = vld [vmem:[#allocation5 + $0x150] sm:$0xff]  }
  0x47   :  { %1193 = vmatprep.subr.bf16.mxu1 %v1320_v18  ;;  %v236_v58 = vpack.c.bf16 %v202_v51, %v148_v50  ;;  %v235_v59 = vpack.c.bf16 %v201_v53, %v147_v52  ;;  %v1355_v11 = vld [vmem:[#allocation5 + $0x118] sm:$0xff]   ;;  %v1362_v13 = vld [vmem:[#allocation2 + $0x8] ss:$12 sps:$4 sm:$0xff]   ;;  %v1363_v14 = vld [vmem:[#allocation2 + $0x20] ss:$12 sps:$4 sm:$0xff]  }
  0x48   :  { %1172 = vmatpush3.bf16.msra.mxu0 %v1319_v17  ;;  %v238_v3 = vpack.c.bf16 %v204_v1, %v150_v62  ;;  %v237_v4 = vpack.c.bf16 %v203_v2, %v149_v63  ;;  %v1364_v15 = vld [vmem:[#allocation2 + $0x38] ss:$12 sps:$4 sm:$0xff]   ;;  %v1365_v16 = vld [vmem:[#allocation2 + $0x50] ss:$12 sps:$4 sm:$0xff]   ;;  %v159_v18 = vrot.slane %v1362_v13, %v1577_v36  ;;  %v1359_v25 = vld [vmem:[#allocation5 + $0x108] sm:$0xff]  }
  0x49   :  { %1173 = vmatprep.subr.bf16.mxu0 %v1322_v20  ;;  %664 = vmatprep.mubr.bf16.mxu0 %v236_v58  ;;  %v1357_v17 = vld [vmem:[#allocation5 + $0x110] sm:$0xff]   ;;  %v213_v20 = vrot.slane %v1364_v15, %v1577_v36  ;;  %v1360_v26 = vld [vmem:[#allocation5 + $0x140] sm:$0xff]   ;;  %v1370_v38 = vld [vmem:[#allocation7 + $0x18] sm:$0xff]  }
  0x4a   :  { %1194 = vmatpush3.bf16.msra.mxu1 %v1321_v19  ;;  %705 = vmatprep.mubr.bf16.mxu1 %v238_v3  ;;  %v166_v19 = vrot.slane %v1363_v14, %v1577_v36  ;;  %v1369_v37 = vld [vmem:[#allocation7 + $0x20] sm:$0xff]   ;;  %v1371_v39 = vld [vmem:[#allocation7 + $0x10] sm:$0xff]   ;;  %v1372_v40 = vld [vmem:[#allocation7 + $0x8] sm:$0xff]  }
  0x4b   :  { %1195 = vmatprep.subr.bf16.mxu1 %v1324_v22  ;;  %v220_v22 = vrot.slane %v1365_v16, %v1577_v36  ;;  %v1368_v36 = vld [vmem:[#allocation7 + $0x28] sm:$0xff]   ;;  %v1373_v41 = vld [vmem:[#allocation7] sm:$0xff]   ;;  %v1375_v43 = vld [vmem:[#allocation8 + $0x30] sm:$0xff]  }
  0x4c   :  { %1174 = vmatpush3.bf16.msra.mxu0 %v1323_v21  ;;  %v1358_v21 = vld [vmem:[#allocation5 + $0x148] sm:$0xff]   ;;  %v1377_v45 = vld [vmem:[#allocation8 + $0x20] sm:$0xff]  }
  0x4d   :  { %1175 = vmatprep.subr.bf16.mxu0 %v1326_v27  ;;  %v222_v24 = vcombine.high %v213_v20, %v220_v22  ;;  %v1376_v44 = vld [vmem:[#allocation8 + $0x28] sm:$0xff]   ;;  %v1091_v55 = vld [vmem:[%s1624_s2] ss:$0 sm:$0xff] }
  0x4e   :  { %1196 = vmatpush3.bf16.msra.mxu1 %v1325_v23  ;;  %v168_v23 = vcombine.high %v159_v18, %v166_v19  ;;  %v1381_v13 = vld [vmem:[#allocation8] sm:$0xff]  }
  0x4f   :  { %1197 = vmatprep.subr.bf16.mxu1 %v1328_v29  ;;  %v221_v29 = vcombine.low %v213_v20, %v220_v22  ;;  %v1140_v14 = vld [vmem:[%s1626_s4] ss:$0 sm:$0xff] }
  0x50   :  { %1176 = vmatpush3.bf16.msra.mxu0 %v1327_v28  ;;  %v240_v27 = vpack.c.bf16 %v222_v24, %v168_v23  ;;  %v167_v28 = vcombine.low %v159_v18, %v166_v19  ;;  %v1149_v24 = vld [vmem:[%s1628_s6] ss:$0 sm:$0xff] }
  0x51   :  { %1177 = vmatprep.subr.bf16.mxu0 %v1330_v33  ;;  %v1366_v33 = vld [vmem:[#allocation7 + $0x38] sm:$0xff]  }
  0x52   :  { %1198 = vmatpush3.bf16.msra.mxu1 %v1329_v30  ;;  %v1361_v30 = vld [vmem:[#allocation5 + $0x100] sm:$0xff]   ;;  %v239_v31 = vpack.c.bf16 %v221_v29, %v167_v28 }
  0x53   :  { %1199 = vmatprep.subr.bf16.mxu1 %v1332_v35  ;;  %v1367_v35 = vld [vmem:[#allocation7 + $0x30] sm:$0xff]  }
  0x54   :  { %1178 = vmatpush3.bf16.msra.mxu0 %v1331_v34  ;;  %v1507_v34 = vmov 0.0  }
  0x55   :  { %1207 = vmatprep.subr.bf16.mxu0 %v1342_v46  ;;  %v1378_v46 = vld [vmem:[#allocation8 + $0x18] sm:$0xff]  }
  0x56   :  { %1200 = vmatpush3.bf16.msra.mxu1 %v1341_v42  ;;  %v1374_v42 = vld [vmem:[#allocation8 + $0x38] sm:$0xff]  }
  0x57   :  { %665 = vmatmul.mubr.bf16.vlgmr.msra.gmra.mxu0 %v235_v59  ;;  %1247 = vmatprep.subr.bf16.mxu1 %v1507_v34 }
  0x58   :  { %1208 = vmatpush3.bf16.msra.mxu0 %v1347_v61  ;;  %746 = vmatprep.mubr.bf16.mxu0 %v240_v27 }
  0x59   :  { %1209 = vmatprep.subr.bf16.mxu0 %v1348_v0  ;;  %706 = vmatmul.mubr.bf16.vlgmr.msra.gmra.mxu1 %v237_v4 }
  0x5a   :  { %1248 = vmatpush3.bf16.msra.mxu1 %v1366_v33  ;;  %1263 = vmatprep.mubr.msk.bf16.mxu1 %vm1508_vm0, %v1507_v34 }
  0x5b   :  { %1249 = vmatprep.subr.bf16.mxu1 %v1507_v34 }
  0x5c   :  { %1210 = vmatpush3.bf16.msra.mxu0 %v1349_v5 }
  0x5d   :  { %1211 = vmatprep.subr.bf16.mxu0 %v1350_v6 }
  0x5e   :  { %1250 = vmatpush3.bf16.msra.mxu1 %v1367_v35 }
  0x5f   :  { %1251 = vmatprep.subr.bf16.mxu1 %v1507_v34 }
  0x60   :  { %1212 = vmatpush3.bf16.msra.mxu0 %v1351_v7 }
  0x61   :  { %1213 = vmatprep.subr.bf16.mxu0 %v1352_v8 }
  0x62   :  { %1252 = vmatpush3.bf16.msra.mxu1 %v1368_v36 }
  0x63   :  { %1253 = vmatprep.subr.bf16.mxu1 %v1507_v34 }
  0x64   :  { %1214 = vmatpush3.bf16.msra.mxu0 %v1353_v9 }
  0x65   :  { %1215 = vmatprep.subr.bf16.mxu0 %v1354_v10 }
  0x66   :  { %1254 = vmatpush3.bf16.msra.mxu1 %v1369_v37 }
  0x67   :  { %1255 = vmatprep.subr.bf16.mxu1 %v1507_v34 }
  0x68   :  { %1216 = vmatpush3.bf16.msra.mxu0 %v1355_v11  ;;  %v1379_v11 = vld [vmem:[#allocation8 + $0x10] sm:$0xff]  }
  0x69   :  { %1217 = vmatprep.subr.bf16.mxu0 %v1356_v12  ;;  %v1380_v12 = vld [vmem:[#allocation8 + $0x8] sm:$0xff]  }
  0x6a   :  { %1256 = vmatpush3.bf16.msra.mxu1 %v1370_v38 }
  0x6b   :  { %1257 = vmatprep.subr.bf16.mxu1 %v1507_v34 }
  0x6c   :  { %1218 = vmatpush3.bf16.msra.mxu0 %v1357_v17 }
  0x6d   :  { %1219 = vmatprep.subr.bf16.mxu0 %v1358_v21 }
  0x6e   :  { %1258 = vmatpush3.bf16.msra.mxu1 %v1371_v39 }
  0x6f   :  { %1259 = vmatprep.subr.bf16.mxu1 %v1507_v34 }
  0x70   :  { %1220 = vmatpush3.bf16.msra.mxu0 %v1359_v25 }
  0x71   :  { %1221 = vmatprep.subr.bf16.mxu0 %v1360_v26 }
  0x72   :  { %1260 = vmatpush3.bf16.msra.mxu1 %v1372_v40 }
  0x73   :  { %1261 = vmatprep.subr.bf16.mxu1 %v1507_v34 }
  0x74   :  { %1222 = vmatpush3.bf16.msra.mxu0 %v1361_v30 }
  0x75   :  { %1267 = vmatprep.subr.bf16.mxu0 %v1507_v34 }
  0x76   :  { %1262 = vmatpush3.bf16.msra.mxu1 %v1373_v41 }
  0x77   :  { %747 = vmatmul.mubr.bf16.vlgmr.msra.gmra.mxu0 %v239_v31 }
  0x78   :  { %1283 = vmatprep.mubr.msk.bf16.mxu0 %vm1508_vm0, %v1507_v34  ;;  %1268 = vmatpush3.bf16.msra.mxu0 %v1374_v42  ;;  %v1509_v42 = vmov 1966171168  }
  0x79   :  { %1269 = vmatprep.subr.bf16.mxu0 %v1507_v34 }
  0x7c   :  { %1270 = vmatpush3.bf16.msra.mxu0 %v1375_v43  ;;  %v1009_v43 = vunpack.c.l.s4 %v1509_v42 }
  0x7d   :  { %1271 = vmatprep.subr.bf16.mxu0 %v1507_v34 }
  0x80   :  { %1272 = vmatpush3.bf16.msra.mxu0 %v1376_v44 }
  0x81   :  { %1273 = vmatprep.subr.bf16.mxu0 %v1507_v34 }
  0x84   :  { %1274 = vmatpush3.bf16.msra.mxu0 %v1377_v45 }
  0x85   :  { %1275 = vmatprep.subr.bf16.mxu0 %v1507_v34 }
  0x88   :  { %1276 = vmatpush3.bf16.msra.mxu0 %v1378_v46  ;;  %v1010_v46 = vunpack.c.0.s8 %v1009_v43 }
  0x89   :  { %1277 = vmatprep.subr.bf16.mxu0 %v1507_v34 }
  0x8c   :  { %1278 = vmatpush3.bf16.msra.mxu0 %v1379_v11 }
  0x8d   :  { %1279 = vmatprep.subr.bf16.mxu0 %v1507_v34 }
  0x90   :  { %1280 = vmatpush3.bf16.msra.mxu0 %v1380_v12 }
  0x91   :  { %1281 = vmatprep.subr.bf16.mxu0 %v1507_v34 }
  0x94   :  { %1282 = vmatpush3.bf16.msra.mxu0 %v1381_v13 }
 0x117   :  { %v1179_v47 = vpop.f32.mrf.mxu0 }
 0x119   :  { %v1180_v48 = vpop.f32.mrf.mxu0  ;;  %v1201_v49 = vpop.f32.mrf.mxu1 }
 0x11a   :  { %v1181_v54 = vadd.f32 %v1180_v48, %v1179_v47 }
 0x11b   :  { %v1182_v50 = vpop.f32.mrf.mxu0  ;;  %v1202_v51 = vpop.f32.mrf.mxu1 }
 0x11c   :  { %v667_v59 = vadd.f32 %v1181_v54, %v1091_v55  ;;  %v1203_v60 = vadd.f32 %v1202_v51, %v1201_v49 }
 0x11d   :  { %v1183_v52 = vpop.f32.mrf.mxu0  ;;  %v1204_v53 = vpop.f32.mrf.mxu1 }
 0x11e   :  { %v1184_v56 = vadd.f32 %v1183_v52, %v1182_v50  ;;  %v708_v2 = vadd.f32 %v1203_v60, %v667_v59  ;;  %v1013_v50 = vsub.s32 %v1010_v46, %v1574_v32 }
 0x11f   :  { %v1205_v57 = vpop.f32.mrf.mxu1 }
 0x120   :  { %v670_v62 = vadd.f32 %v1184_v56, %v1091_v55  ;;  %v1206_v63 = vadd.f32 %v1205_v57, %v1204_v53 }
 0x122   :  { %v711_v4 = vadd.f32 %v1206_v63, %v670_v62 }
 0x137   :  { %v1223_v58 = vpop.f32.mrf.mxu0 }
 0x139   :  { %v1224_v61 = vpop.f32.mrf.mxu0 }
 0x13a   :  { %v1225_v0 = vadd.f32 %v1224_v61, %v1223_v58 }
 0x13b   :  { %v1226_v1 = vpop.f32.mrf.mxu0 }
 0x13c   :  { %v749_v5 = vadd.f32 %v1225_v0, %v708_v2 }
 0x13d   :  { %v1227_v3 = vpop.f32.mrf.mxu0 }
 0x13e   :  { %v1228_v6 = vadd.f32 %v1227_v3, %v1226_v1  ;;  %v755_v8 = vmax.f32 %v749_v5, 0.0 }
 0x140   :  { %v752_v7 = vadd.f32 %v1228_v6, %v711_v4 }
 0x142   :  { %v756_v9 = vmax.f32 %v752_v7, 0.0 }
 0x144   :  { %v757_v10 = vpack.c.bf16 %v756_v9, %v755_v8 }
 0x146   :  { %1264 = vmatmul.mubr.bf16.vlgmr.msra.gmra.mxu1 %v757_v10 }
 0x206   :  { %v863_v15 = vpop.f32.mrf.mxu1 }
 0x207   :  { %v864_v17 = vadd.f32 %v1140_v14, %v863_v15 }
 0x208   :  { %v1265_v16 = vpop.f32.mrf.mxu1 }
 0x209   :  { %v870_v21 = vmax.f32 %v864_v17, 0.0 }
 0x20a   :  { %v866_v18 = vpop.f32.mrf.mxu1 }
 0x20b   :  { %v867_v19 = vadd.f32 %v1140_v14, %v866_v18 }
 0x20c   :  { %v1266_v20 = vpop.f32.mrf.mxu1 }
 0x20d   :  { %v871_v22 = vmax.f32 %v867_v19, 0.0 }
 0x20f   :  { %v872_v23 = vpack.c.bf16 %v871_v22, %v870_v21 }
 0x211   :  { %1284 = vmatmul.mubr.bf16.vlgmr.msra.gmra.mxu0 %v872_v23 }
 0x2d1   :  { %v978_v25 = vpop.f32.mrf.mxu0 }
 0x2d2   :  { %v979_v26 = vadd.f32 %v1149_v24, %v978_v25 }
 0x2d3   :  { %v1285_v27 = vpop.f32.mrf.mxu0 }
 0x2d4   :  { %985 = vmax.xlane.f32.xlu0 %v979_v26 }
 0x2d5   :  { %v981_v28 = vpop.f32.mrf.mxu0 }
 0x2d6   :  { %v982_v29 = vadd.f32 %v1149_v24, %v981_v28 }
 0x2d7   :  { %v1286_v30 = vpop.f32.mrf.mxu0 }
 0x2d8   :  { %987 = vmax.xlane.f32.xlu0 %v982_v29 }
 0x35d   :  { %v986_v31 = vpop.xlane.xlu0 %985 }
 0x35e   :  { %v989_v33 = vsub.f32 %v979_v26, %v986_v31 }
 0x360   :  { %v991_v34 = vmul.f32 1.442695, %v989_v33 }
 0x361   :  { %v988_v35 = vpop.xlane.xlu0 %987 }
 0x362   :  { %v990_v36 = vsub.f32 %v982_v29, %v988_v35  ;;  %1382 = vpow2.f32 %v991_v34 }
 0x364   :  { %v993_v37 = vmul.f32 1.442695, %v990_v36 }
 0x366   :  { %1384 = vpow2.f32 %v993_v37 }
 0x36f   :  { %v1383_v38 = vpop.eup %1382 }
 0x370   :  { %995 = vadd.xlane.f32.xlu1 %v1383_v38 }
 0x373   :  { %v1385_v39 = vpop.eup %1384 }
 0x374   :  { %997 = vadd.xlane.f32.xlu1 %v1385_v39 }
 0x3f9   :  { %v996_v40 = vpop.xlane.xlu1 %995 }
 0x3fa   :  { %1386 = vlog2.f32 %v996_v40 }
 0x3fd   :  { %v998_v41 = vpop.xlane.xlu1 %997 }
 0x3fe   :  { %1388 = vlog2.f32 %v998_v41 }
 0x407   :  { %v1387_v44 = vpop.eup %1386 }
 0x408   :  { %v1000_v45 = vmul.f32 0.6931472, %v1387_v44 }
 0x40a   :  { %v1003_v49 = vsub.f32 %v989_v33, %v1000_v45 }
 0x40b   :  { %v1389_v47 = vpop.eup %1388 }
 0x40c   :  { %v1002_v48 = vmul.f32 0.6931472, %v1389_v47 }
 0x40e   :  { %v1004_v51 = vsub.f32 %v990_v36, %v1002_v48 }
 0x410   :  { %v1005_v52 = vpack.c.bf16 %v1004_v51, %v1003_v49  ;;  %v1158_v53 = vpack.c.bf16 %v1004_v51, %v1004_v51 }
 0x412   :  { %v1014_v54 = vrot.slane %v1005_v52, %v1013_v50  ;;  %v1021_v55 = vrot.slane %v1158_v53, %v1013_v50 }
 0x414   :  { %v1022_v56 = vcombine.high %v1014_v54, %v1014_v54  ;;  %v1023_v57 = vcombine.high %v1021_v55, %v1021_v55  ;;  %v1030_v58 = vrot.slane %v1014_v54, %v1013_v50  ;;  %v1037_v59 = vrot.slane %v1021_v55, %v1013_v50  ;;  %1159 = vst.sshfl [vmem:[#allocation10] sm:$0x1 pattern:$0x73625140] %v1014_v54 }
 0x415   :  { %1161 = vst.sshfl [vmem:[#allocation10 + $0x4] sm:$0x1 pattern:$0x73625140] %v1021_v55 }
 0x416   :  { %v1044_v60 = vrot.slane %v1022_v56, %v1013_v50  ;;  %v1051_v61 = vrot.slane %v1023_v57, %v1013_v50  ;;  %v1052_v62 = vcombine.high %v1030_v58, %v1030_v58  ;;  %v1053_v63 = vcombine.high %v1037_v59, %v1037_v59  ;;  %1160 = vst.sshfl [vmem:[#allocation10 + $0x1] sm:$0x1 pattern:$0x73625140] %v1022_v56 }
 0x417   :  { %1162 = vst.sshfl [vmem:[#allocation10 + $0x5] sm:$0x1 pattern:$0x73625140] %v1023_v57 }
 0x418   :  { %v1054_v0 = vcombine.high %v1044_v60, %v1044_v60  ;;  %v1055_v1 = vcombine.high %v1051_v61, %v1051_v61  ;;  %1066 = vst [vmem:[#allocation10 + $0x2] sm:$0x1] %v1052_v62  ;;  %1070 = vst [vmem:[#allocation10 + $0x6] sm:$0x1] %v1053_v63 }
 0x41a   :  { %1067 = vst [vmem:[#allocation10 + $0x3] sm:$0x1] %v1054_v0  ;;  %1071 = vst [vmem:[#allocation10 + $0x7] sm:$0x1] %v1055_v1 }
 0x41b   :  { %1076 = vsyncadd [#allocation4], 112  ;;  %s1510_s4 = smov [#allocation10]  }
 0x41c   :  { %s1077_s6 = sshll.u32 %s1510_s4, 4  ;;  %s1078_s6 = int_to_ptr.vmem [resolvable:$true] %s1077_s6 }
 0x41d   :  { %s1470_s27 = scalar_lea.vmem %s1078_s6, 16  ;;  %s1474_s28 = scalar_lea.vmem %s1078_s6, 128 }
 0x41e   :  { %p1471_p6 = scmp.ne.s32.totalorder %s1078_s6, %s1470_s27  ;;  %p1475_p7 = scmp.lt.s32.totalorder %s1078_s6, %s1078_s6 }
 0x41f   :  { %p1476_p8 = scmp.lt.s32.totalorder %s1474_s28, %s1470_s27 }
 0x421   :  { %p1477_p9 = por %p1476_p8, %p1475_p7 }
 0x423   :  { %p1478_p10 = pnand %p1477_p9, %p1471_p6 }
 0x425   :  { %1481 = shalt.err (!%p1478_p10)
}
 0x426   :  { %s1511_s29 = smov 16   ;;  %s1512_s30 = smov 1  }
 0x427   :  { %1083 = dma.vmem_to_hbm [thread:$0]  %s1078_s6, 16, %s1629_s7, [#allocation4], %s1511_s29, %s1511_s29, %s1512_s30  }
 0x428   :  { %1496 = dma.done.wait [#allocation4], 128  }
 0x429   :  { %1497 = vsyncadd [#allocation4], 4294967168 }
 0x42a   :  { %1087 = vsyncpa [#allocation3], 1 }
 0x42b   :  { %1088 = vsyncpa [#allocation6], 1 }
 0x42c   :  { %1089 = vsyncpa [#allocation9], 1 }
 0x42d   :  { %1090 = vsyncpa [#allocation4], 1 }

</bundles_post_ra>
